<compile_context>
chip_gen: v5e
topology: v5e:2x2
jax: 0.10.0
libtpu: 0.0.40
codegen_flags: <defaults>
</compile_context>

<pallas_src>
from functools import partial

import jax
import jax.numpy as jnp
from jax.experimental import pallas as pl
from jax.experimental.pallas import tpu as pltpu


# --------------------------------------------------------------------------
# Fused Pallas kernel: GATConv -> ELU -> GATConv -> log_softmax
# --------------------------------------------------------------------------
def _gat_fused_kernel(x_ref, adj_ref, w1_ref, att1_ref, w2_ref, att2_ref,
                      out_ref, *, H, C1, C2):
    """
    x_ref:    [N, Fin]     node features
    adj_ref:  [N, N]       adj[i, j] != 0  iff edge j -> i (self loops incl.)
    w1_ref:   [Fin,  H*C1] layer-1 projection, heads concatenated on columns
    att1_ref: [3,    H*C1] rows: att_src, att_dst, bias (head-major columns)
    w2_ref:   [H*C1, H*C2] layer-2 projection
    att2_ref: [3,    H*C2]
    out_ref:  [N,    H*C2] log-probabilities
    """
    # Mask predicate computed once, reused by both layers / all heads.
    mask = adj_ref[...] > 0.0                                       # [N, N]

    def gat_layer(feat, w_ref, att_ref, C, apply_elu):
        # One projection matmul for ALL heads (heads live on lanes).
        xw = jnp.dot(feat, w_ref[...],
                     preferred_element_type=jnp.float32)            # [N, H*C]
        att = att_ref[...]                                          # [3, H*C]

        outs = []
        for h in range(H):                                          # static, small H
            sl = slice(h * C, (h + 1) * C)
            xw_h = xw[:, sl]                                        # [N, C]
            a_src = att[0:1, sl]                                    # [1, C]
            a_dst = att[1:2, sl]                                    # [1, C]
            bias_h = att[2:3, sl]                                   # [1, C]

            # alpha_dst[i]: VPU lane-reduce -> natural [N, 1] column layout.
            alpha_dst = jnp.sum(xw_h * a_dst, axis=-1, keepdims=True)  # [N, 1]
            # alpha_src[j] as a row vector [1, N]: a tiny MXU contraction
            # yields the transposed orientation for free.
            alpha_src_row = jax.lax.dot_general(
                a_src, xw_h, (((1,), (1,)), ((), ())),
                preferred_element_type=jnp.float32)                 # [1, N]

            # e[i, j] = leaky_relu(alpha_src[j] + alpha_dst[i], 0.2)
            e = alpha_dst + alpha_src_row                           # [N, N]
            e = jnp.where(e > 0, e, 0.2 * e)
            e = jnp.where(mask, e, jnp.float32(-1e30))

            # Softmax over source nodes j with deferred normalization.
            m = jnp.max(e, axis=-1, keepdims=True)                  # finite (self-loop)
            p = jnp.exp(e - m)                                      # masked -> 0
            denom = jnp.sum(p, axis=-1, keepdims=True)              # [N, 1]

            # Aggregate first, normalize the small [N, C] result afterwards.
            agg = jnp.dot(p, xw_h,
                          preferred_element_type=jnp.float32)       # [N, C]
            o = agg * pl.reciprocal(denom, approx=True) + bias_h
            if apply_elu:
                o = jnp.where(o > 0, o, jnp.exp(o) - 1.0)           # F.elu
            outs.append(o)
        return jnp.concatenate(outs, axis=-1)                       # [N, H*C]

    h1 = gat_layer(x_ref[...].astype(jnp.float32), w1_ref, att1_ref, C1,
                   apply_elu=True)
    # F.dropout(p=0.5) is identity in eval mode.
    h2 = gat_layer(h1, w2_ref, att2_ref, C2, apply_elu=False)

    # Fused log_softmax over classes (dim=1).
    m = jnp.max(h2, axis=-1, keepdims=True)
    s = h2 - m
    lse = jnp.log(jnp.sum(jnp.exp(s), axis=-1, keepdims=True))
    out_ref[...] = s - lse


# --------------------------------------------------------------------------
# Wrappers
# --------------------------------------------------------------------------
def gat_forward(x, adj, w1, att1, w2, att2, *, num_heads):
    """Full GAT forward pass in a single Pallas kernel.

    x:    [N, Fin]      adj:  [N, N]
    w1:   [Fin,  H*C1]  att1: [3, H*C1]  (att_src / att_dst / bias rows)
    w2:   [H*C1, H*C2]  att2: [3, H*C2]
    returns log-probabilities [N, H*C2]
    """
    N = x.shape[0]
    HC2 = w2.shape[1]
    C1 = w1.shape[1] // num_heads
    C2 = HC2 // num_heads
    kernel = partial(_gat_fused_kernel, H=num_heads, C1=C1, C2=C2)

    # Single launch, no grid: every operand is a full-array VMEM block and the
    # layer-1 activations stay resident in VMEM between the two GATConv layers.
    return pl.pallas_call(
        kernel,
        out_shape=jax.ShapeDtypeStruct((N, HC2), jnp.float32),
        compiler_params=pltpu.CompilerParams(vmem_limit_bytes=64 << 20),
    )(x, adj, w1, att1, w2, att2)


def build_adj(edge_index, num_nodes):
    """Dense adjacency: adj[dst, src] = 1 for each edge, plus self loops."""
    src = edge_index[0]
    dst = edge_index[1]
    adj = jnp.zeros((num_nodes, num_nodes), jnp.float32).at[dst, src].set(1.0)
    idx = jnp.arange(num_nodes)
    return adj.at[idx, idx].set(1.0)  # add_self_loops=True


# --------------------------------------------------------------------------
# Demo
# --------------------------------------------------------------------------
if __name__ == "__main__":
    N, num_features, hidden_dim, num_classes, num_heads = 8, 16, 8, 4, 2

    key = jax.random.PRNGKey(0)
    keys = jax.random.split(key, 8)

    x = jax.random.normal(keys[0], (N, num_features), jnp.float32)
    src = jnp.array([0, 1, 2, 3, 4, 5, 6, 7, 0, 2, 4, 6], dtype=jnp.int32)
    dst = jnp.array([1, 2, 3, 4, 5, 6, 7, 0, 3, 5, 7, 1], dtype=jnp.int32)
    edge_index = jnp.stack([src, dst])  # [2, E]
    adj = build_adj(edge_index, N)

    HC1 = num_heads * hidden_dim     # 16
    HC2 = num_heads * num_classes    # 8

    # Layer-1 params (heads concatenated head-major on output columns, same
    # layout as torch_geometric's GATConv lin weight).
    w1 = 0.1 * jax.random.normal(keys[1], (num_features, HC1), jnp.float32)
    att1 = jnp.concatenate([
        0.1 * jax.random.normal(keys[2], (1, HC1), jnp.float32),   # att_src
        0.1 * jax.random.normal(keys[3], (1, HC1), jnp.float32),   # att_dst
        jnp.zeros((1, HC1), jnp.float32),                          # bias
    ], axis=0)

    # Layer-2 params.
    w2 = 0.1 * jax.random.normal(keys[4], (HC1, HC2), jnp.float32)
    att2 = jnp.concatenate([
        0.1 * jax.random.normal(keys[5], (1, HC2), jnp.float32),
        0.1 * jax.random.normal(keys[6], (1, HC2), jnp.float32),
        jnp.zeros((1, HC2), jnp.float32),
    ], axis=0)

    out = gat_forward(x, adj, w1, att1, w2, att2, num_heads=num_heads)
    out = jax.block_until_ready(out)

    assert out.shape == (N, HC2)
    assert bool(jnp.all(jnp.isfinite(out)))
    # Rows of log_softmax output should exponentiate-and-sum to ~1.
    assert bool(jnp.all(jnp.abs(jnp.sum(jnp.exp(out), axis=-1) - 1.0) < 1e-3))
    print("KERNEL_OK")
</pallas_src>

<mosaic_0001>
module attributes {stable_mosaic.version = 11 : i64} {
  func.func @_gat_fused_kernel(%arg0: memref<8x16xf32, #tpu.memory_space<vmem>>, %arg1: memref<8x8xf32, #tpu.memory_space<vmem>>, %arg2: memref<16x16xf32, #tpu.memory_space<vmem>>, %arg3: memref<3x16xf32, #tpu.memory_space<vmem>>, %arg4: memref<16x8xf32, #tpu.memory_space<vmem>>, %arg5: memref<3x8xf32, #tpu.memory_space<vmem>>, %arg6: memref<8x8xf32, #tpu.memory_space<vmem>>) attributes {dimension_semantics = [], scalar_prefetch = 0 : i64, scratch_operands = 0 : i64, tpu.core_type = #tpu.core_type<tc>} {
    %c0 = arith.constant 0 : index
    %c0_0 = arith.constant 0 : index
    %0 = vector.load %arg1[%c0, %c0_0] : memref<8x8xf32, #tpu.memory_space<vmem>>, vector<8x8xf32>
    %cst = arith.constant 0.000000e+00 : f32
    %1 = vector.broadcast %cst : f32 to vector<8x8xf32>
    %2 = arith.cmpf ogt, %0, %1 : vector<8x8xf32>
    %c0_1 = arith.constant 0 : index
    %c0_2 = arith.constant 0 : index
    %3 = vector.load %arg0[%c0_1, %c0_2] : memref<8x16xf32, #tpu.memory_space<vmem>>, vector<8x16xf32>
    %c0_3 = arith.constant 0 : index
    %c0_4 = arith.constant 0 : index
    %4 = vector.load %arg2[%c0_3, %c0_4] : memref<16x16xf32, #tpu.memory_space<vmem>>, vector<16x16xf32>
    %cst_5 = arith.constant dense<0.000000e+00> : vector<8x16xf32>
    %5 = tpu.matmul %3, %4, %cst_5 {dimension_numbers = #tpu.dot_dimension_numbers<[1], [0], [0], [1], [0, 0, 1, 1], [], []>} : vector<8x16xf32>, vector<16x16xf32>, vector<8x16xf32> -> vector<8x16xf32>
    %c0_6 = arith.constant 0 : index
    %c0_7 = arith.constant 0 : index
    %6 = vector.load %arg3[%c0_6, %c0_7] : memref<3x16xf32, #tpu.memory_space<vmem>>, vector<3x16xf32>
    %7 = vector.extract_strided_slice %5 {offsets = [0, 0], sizes = [8, 8], strides = [1, 1]} : vector<8x16xf32> to vector<8x8xf32>
    %8 = vector.extract_strided_slice %6 {offsets = [0, 0], sizes = [1, 8], strides = [1, 1]} : vector<3x16xf32> to vector<1x8xf32>
    %9 = vector.extract_strided_slice %6 {offsets = [1, 0], sizes = [1, 8], strides = [1, 1]} : vector<3x16xf32> to vector<1x8xf32>
    %10 = vector.extract_strided_slice %6 {offsets = [2, 0], sizes = [1, 8], strides = [1, 1]} : vector<3x16xf32> to vector<1x8xf32>
    %11 = vector.broadcast %9 : vector<1x8xf32> to vector<8x8xf32>
    %12 = arith.mulf %7, %11 : vector<8x8xf32>
    %cst_8 = arith.constant dense<0.000000e+00> : vector<8xf32>
    %13 = vector.multi_reduction <add>, %12, %cst_8 [1] : vector<8x8xf32> to vector<8xf32>
    %14 = vector.shape_cast %13 : vector<8xf32> to vector<8x1xf32>
    %cst_9 = arith.constant dense<0.000000e+00> : vector<1x8xf32>
    %15 = tpu.matmul %8, %7, %cst_9 {dimension_numbers = #tpu.dot_dimension_numbers<[1], [1], [0], [0], [0, 0, 1, 0], [], []>} : vector<1x8xf32>, vector<8x8xf32>, vector<1x8xf32> -> vector<1x8xf32>
    %16 = vector.broadcast %14 : vector<8x1xf32> to vector<8x8xf32>
    %17 = vector.broadcast %15 : vector<1x8xf32> to vector<8x8xf32>
    %18 = arith.addf %16, %17 : vector<8x8xf32>
    %cst_10 = arith.constant 0.000000e+00 : f32
    %19 = vector.broadcast %cst_10 : f32 to vector<8x8xf32>
    %20 = arith.cmpf ogt, %18, %19 : vector<8x8xf32>
    %cst_11 = arith.constant 2.000000e-01 : f32
    %21 = vector.broadcast %cst_11 : f32 to vector<8x8xf32>
    %22 = arith.mulf %21, %18 : vector<8x8xf32>
    %23 = arith.select %20, %18, %22 : vector<8x8xi1>, vector<8x8xf32>
    %cst_12 = arith.constant -1.000000e+30 : f32
    %24 = vector.broadcast %cst_12 : f32 to vector<8x8xf32>
    %25 = arith.select %2, %23, %24 : vector<8x8xi1>, vector<8x8xf32>
    %cst_13 = arith.constant dense<0xFF800000> : vector<8xf32>
    %26 = vector.multi_reduction <maximumf>, %25, %cst_13 [1] : vector<8x8xf32> to vector<8xf32>
    %27 = vector.shape_cast %26 : vector<8xf32> to vector<8x1xf32>
    %28 = vector.broadcast %27 : vector<8x1xf32> to vector<8x8xf32>
    %29 = arith.subf %25, %28 : vector<8x8xf32>
    %30 = math.exp %29 : vector<8x8xf32>
    %cst_14 = arith.constant dense<0.000000e+00> : vector<8xf32>
    %31 = vector.multi_reduction <add>, %30, %cst_14 [1] : vector<8x8xf32> to vector<8xf32>
    %32 = vector.shape_cast %31 : vector<8xf32> to vector<8x1xf32>
    %cst_15 = arith.constant dense<0.000000e+00> : vector<8x8xf32>
    %33 = tpu.matmul %30, %7, %cst_15 {dimension_numbers = #tpu.dot_dimension_numbers<[1], [0], [0], [1], [0, 0, 1, 1], [], []>} : vector<8x8xf32>, vector<8x8xf32>, vector<8x8xf32> -> vector<8x8xf32>
    %34 = tpu.reciprocal %32 {approx = true} : vector<8x1xf32> -> vector<8x1xf32>
    %35 = vector.broadcast %34 : vector<8x1xf32> to vector<8x8xf32>
    %36 = arith.mulf %33, %35 : vector<8x8xf32>
    %37 = vector.broadcast %10 : vector<1x8xf32> to vector<8x8xf32>
    %38 = arith.addf %36, %37 : vector<8x8xf32>
    %cst_16 = arith.constant 0.000000e+00 : f32
    %39 = vector.broadcast %cst_16 : f32 to vector<8x8xf32>
    %40 = arith.cmpf ogt, %38, %39 : vector<8x8xf32>
    %41 = math.exp %38 : vector<8x8xf32>
    %cst_17 = arith.constant 1.000000e+00 : f32
    %42 = vector.broadcast %cst_17 : f32 to vector<8x8xf32>
    %43 = arith.subf %41, %42 : vector<8x8xf32>
    %44 = arith.select %40, %38, %43 : vector<8x8xi1>, vector<8x8xf32>
    %45 = vector.extract_strided_slice %5 {offsets = [0, 8], sizes = [8, 8], strides = [1, 1]} : vector<8x16xf32> to vector<8x8xf32>
    %46 = vector.extract_strided_slice %6 {offsets = [0, 8], sizes = [1, 8], strides = [1, 1]} : vector<3x16xf32> to vector<1x8xf32>
    %47 = vector.extract_strided_slice %6 {offsets = [1, 8], sizes = [1, 8], strides = [1, 1]} : vector<3x16xf32> to vector<1x8xf32>
    %48 = vector.extract_strided_slice %6 {offsets = [2, 8], sizes = [1, 8], strides = [1, 1]} : vector<3x16xf32> to vector<1x8xf32>
    %49 = vector.broadcast %47 : vector<1x8xf32> to vector<8x8xf32>
    %50 = arith.mulf %45, %49 : vector<8x8xf32>
    %cst_18 = arith.constant dense<0.000000e+00> : vector<8xf32>
    %51 = vector.multi_reduction <add>, %50, %cst_18 [1] : vector<8x8xf32> to vector<8xf32>
    %52 = vector.shape_cast %51 : vector<8xf32> to vector<8x1xf32>
    %cst_19 = arith.constant dense<0.000000e+00> : vector<1x8xf32>
    %53 = tpu.matmul %46, %45, %cst_19 {dimension_numbers = #tpu.dot_dimension_numbers<[1], [1], [0], [0], [0, 0, 1, 0], [], []>} : vector<1x8xf32>, vector<8x8xf32>, vector<1x8xf32> -> vector<1x8xf32>
    %54 = vector.broadcast %52 : vector<8x1xf32> to vector<8x8xf32>
    %55 = vector.broadcast %53 : vector<1x8xf32> to vector<8x8xf32>
    %56 = arith.addf %54, %55 : vector<8x8xf32>
    %cst_20 = arith.constant 0.000000e+00 : f32
    %57 = vector.broadcast %cst_20 : f32 to vector<8x8xf32>
    %58 = arith.cmpf ogt, %56, %57 : vector<8x8xf32>
    %cst_21 = arith.constant 2.000000e-01 : f32
    %59 = vector.broadcast %cst_21 : f32 to vector<8x8xf32>
    %60 = arith.mulf %59, %56 : vector<8x8xf32>
    %61 = arith.select %58, %56, %60 : vector<8x8xi1>, vector<8x8xf32>
    %cst_22 = arith.constant -1.000000e+30 : f32
    %62 = vector.broadcast %cst_22 : f32 to vector<8x8xf32>
    %63 = arith.select %2, %61, %62 : vector<8x8xi1>, vector<8x8xf32>
    %cst_23 = arith.constant dense<0xFF800000> : vector<8xf32>
    %64 = vector.multi_reduction <maximumf>, %63, %cst_23 [1] : vector<8x8xf32> to vector<8xf32>
    %65 = vector.shape_cast %64 : vector<8xf32> to vector<8x1xf32>
    %66 = vector.broadcast %65 : vector<8x1xf32> to vector<8x8xf32>
    %67 = arith.subf %63, %66 : vector<8x8xf32>
    %68 = math.exp %67 : vector<8x8xf32>
    %cst_24 = arith.constant dense<0.000000e+00> : vector<8xf32>
    %69 = vector.multi_reduction <add>, %68, %cst_24 [1] : vector<8x8xf32> to vector<8xf32>
    %70 = vector.shape_cast %69 : vector<8xf32> to vector<8x1xf32>
    %cst_25 = arith.constant dense<0.000000e+00> : vector<8x8xf32>
    %71 = tpu.matmul %68, %45, %cst_25 {dimension_numbers = #tpu.dot_dimension_numbers<[1], [0], [0], [1], [0, 0, 1, 1], [], []>} : vector<8x8xf32>, vector<8x8xf32>, vector<8x8xf32> -> vector<8x8xf32>
    %72 = tpu.reciprocal %70 {approx = true} : vector<8x1xf32> -> vector<8x1xf32>
    %73 = vector.broadcast %72 : vector<8x1xf32> to vector<8x8xf32>
    %74 = arith.mulf %71, %73 : vector<8x8xf32>
    %75 = vector.broadcast %48 : vector<1x8xf32> to vector<8x8xf32>
    %76 = arith.addf %74, %75 : vector<8x8xf32>
    %cst_26 = arith.constant 0.000000e+00 : f32
    %77 = vector.broadcast %cst_26 : f32 to vector<8x8xf32>
    %78 = arith.cmpf ogt, %76, %77 : vector<8x8xf32>
    %79 = math.exp %76 : vector<8x8xf32>
    %cst_27 = arith.constant 1.000000e+00 : f32
    %80 = vector.broadcast %cst_27 : f32 to vector<8x8xf32>
    %81 = arith.subf %79, %80 : vector<8x8xf32>
    %82 = arith.select %78, %76, %81 : vector<8x8xi1>, vector<8x8xf32>
    %83 = tpu.concatenate %44, %82 in 1 : vector<8x8xf32>, vector<8x8xf32> -> vector<8x16xf32>
    %c0_28 = arith.constant 0 : index
    %c0_29 = arith.constant 0 : index
    %84 = vector.load %arg4[%c0_28, %c0_29] : memref<16x8xf32, #tpu.memory_space<vmem>>, vector<16x8xf32>
    %cst_30 = arith.constant dense<0.000000e+00> : vector<8x8xf32>
    %85 = tpu.matmul %83, %84, %cst_30 {dimension_numbers = #tpu.dot_dimension_numbers<[1], [0], [0], [1], [0, 0, 1, 1], [], []>} : vector<8x16xf32>, vector<16x8xf32>, vector<8x8xf32> -> vector<8x8xf32>
    %c0_31 = arith.constant 0 : index
    %c0_32 = arith.constant 0 : index
    %86 = vector.load %arg5[%c0_31, %c0_32] : memref<3x8xf32, #tpu.memory_space<vmem>>, vector<3x8xf32>
    %87 = vector.extract_strided_slice %85 {offsets = [0, 0], sizes = [8, 4], strides = [1, 1]} : vector<8x8xf32> to vector<8x4xf32>
    %88 = vector.extract_strided_slice %86 {offsets = [0, 0], sizes = [1, 4], strides = [1, 1]} : vector<3x8xf32> to vector<1x4xf32>
    %89 = vector.extract_strided_slice %86 {offsets = [1, 0], sizes = [1, 4], strides = [1, 1]} : vector<3x8xf32> to vector<1x4xf32>
    %90 = vector.extract_strided_slice %86 {offsets = [2, 0], sizes = [1, 4], strides = [1, 1]} : vector<3x8xf32> to vector<1x4xf32>
    %91 = vector.broadcast %89 : vector<1x4xf32> to vector<8x4xf32>
    %92 = arith.mulf %87, %91 : vector<8x4xf32>
    %cst_33 = arith.constant dense<0.000000e+00> : vector<8xf32>
    %93 = vector.multi_reduction <add>, %92, %cst_33 [1] : vector<8x4xf32> to vector<8xf32>
    %94 = vector.shape_cast %93 : vector<8xf32> to vector<8x1xf32>
    %cst_34 = arith.constant dense<0.000000e+00> : vector<1x8xf32>
    %95 = tpu.matmul %88, %87, %cst_34 {dimension_numbers = #tpu.dot_dimension_numbers<[1], [1], [0], [0], [0, 0, 1, 0], [], []>} : vector<1x4xf32>, vector<8x4xf32>, vector<1x8xf32> -> vector<1x8xf32>
    %96 = vector.broadcast %94 : vector<8x1xf32> to vector<8x8xf32>
    %97 = vector.broadcast %95 : vector<1x8xf32> to vector<8x8xf32>
    %98 = arith.addf %96, %97 : vector<8x8xf32>
    %cst_35 = arith.constant 0.000000e+00 : f32
    %99 = vector.broadcast %cst_35 : f32 to vector<8x8xf32>
    %100 = arith.cmpf ogt, %98, %99 : vector<8x8xf32>
    %cst_36 = arith.constant 2.000000e-01 : f32
    %101 = vector.broadcast %cst_36 : f32 to vector<8x8xf32>
    %102 = arith.mulf %101, %98 : vector<8x8xf32>
    %103 = arith.select %100, %98, %102 : vector<8x8xi1>, vector<8x8xf32>
    %cst_37 = arith.constant -1.000000e+30 : f32
    %104 = vector.broadcast %cst_37 : f32 to vector<8x8xf32>
    %105 = arith.select %2, %103, %104 : vector<8x8xi1>, vector<8x8xf32>
    %cst_38 = arith.constant dense<0xFF800000> : vector<8xf32>
    %106 = vector.multi_reduction <maximumf>, %105, %cst_38 [1] : vector<8x8xf32> to vector<8xf32>
    %107 = vector.shape_cast %106 : vector<8xf32> to vector<8x1xf32>
    %108 = vector.broadcast %107 : vector<8x1xf32> to vector<8x8xf32>
    %109 = arith.subf %105, %108 : vector<8x8xf32>
    %110 = math.exp %109 : vector<8x8xf32>
    %cst_39 = arith.constant dense<0.000000e+00> : vector<8xf32>
    %111 = vector.multi_reduction <add>, %110, %cst_39 [1] : vector<8x8xf32> to vector<8xf32>
    %112 = vector.shape_cast %111 : vector<8xf32> to vector<8x1xf32>
    %cst_40 = arith.constant dense<0.000000e+00> : vector<8x4xf32>
    %113 = tpu.matmul %110, %87, %cst_40 {dimension_numbers = #tpu.dot_dimension_numbers<[1], [0], [0], [1], [0, 0, 1, 1], [], []>} : vector<8x8xf32>, vector<8x4xf32>, vector<8x4xf32> -> vector<8x4xf32>
    %114 = tpu.reciprocal %112 {approx = true} : vector<8x1xf32> -> vector<8x1xf32>
    %115 = vector.broadcast %114 : vector<8x1xf32> to vector<8x4xf32>
    %116 = arith.mulf %113, %115 : vector<8x4xf32>
    %117 = vector.broadcast %90 : vector<1x4xf32> to vector<8x4xf32>
    %118 = arith.addf %116, %117 : vector<8x4xf32>
    %119 = vector.extract_strided_slice %85 {offsets = [0, 4], sizes = [8, 4], strides = [1, 1]} : vector<8x8xf32> to vector<8x4xf32>
    %120 = vector.extract_strided_slice %86 {offsets = [0, 4], sizes = [1, 4], strides = [1, 1]} : vector<3x8xf32> to vector<1x4xf32>
    %121 = vector.extract_strided_slice %86 {offsets = [1, 4], sizes = [1, 4], strides = [1, 1]} : vector<3x8xf32> to vector<1x4xf32>
    %122 = vector.extract_strided_slice %86 {offsets = [2, 4], sizes = [1, 4], strides = [1, 1]} : vector<3x8xf32> to vector<1x4xf32>
    %123 = vector.broadcast %121 : vector<1x4xf32> to vector<8x4xf32>
    %124 = arith.mulf %119, %123 : vector<8x4xf32>
    %cst_41 = arith.constant dense<0.000000e+00> : vector<8xf32>
    %125 = vector.multi_reduction <add>, %124, %cst_41 [1] : vector<8x4xf32> to vector<8xf32>
    %126 = vector.shape_cast %125 : vector<8xf32> to vector<8x1xf32>
    %cst_42 = arith.constant dense<0.000000e+00> : vector<1x8xf32>
    %127 = tpu.matmul %120, %119, %cst_42 {dimension_numbers = #tpu.dot_dimension_numbers<[1], [1], [0], [0], [0, 0, 1, 0], [], []>} : vector<1x4xf32>, vector<8x4xf32>, vector<1x8xf32> -> vector<1x8xf32>
    %128 = vector.broadcast %126 : vector<8x1xf32> to vector<8x8xf32>
    %129 = vector.broadcast %127 : vector<1x8xf32> to vector<8x8xf32>
    %130 = arith.addf %128, %129 : vector<8x8xf32>
    %cst_43 = arith.constant 0.000000e+00 : f32
    %131 = vector.broadcast %cst_43 : f32 to vector<8x8xf32>
    %132 = arith.cmpf ogt, %130, %131 : vector<8x8xf32>
    %cst_44 = arith.constant 2.000000e-01 : f32
    %133 = vector.broadcast %cst_44 : f32 to vector<8x8xf32>
    %134 = arith.mulf %133, %130 : vector<8x8xf32>
    %135 = arith.select %132, %130, %134 : vector<8x8xi1>, vector<8x8xf32>
    %cst_45 = arith.constant -1.000000e+30 : f32
    %136 = vector.broadcast %cst_45 : f32 to vector<8x8xf32>
    %137 = arith.select %2, %135, %136 : vector<8x8xi1>, vector<8x8xf32>
    %cst_46 = arith.constant dense<0xFF800000> : vector<8xf32>
    %138 = vector.multi_reduction <maximumf>, %137, %cst_46 [1] : vector<8x8xf32> to vector<8xf32>
    %139 = vector.shape_cast %138 : vector<8xf32> to vector<8x1xf32>
    %140 = vector.broadcast %139 : vector<8x1xf32> to vector<8x8xf32>
    %141 = arith.subf %137, %140 : vector<8x8xf32>
    %142 = math.exp %141 : vector<8x8xf32>
    %cst_47 = arith.constant dense<0.000000e+00> : vector<8xf32>
    %143 = vector.multi_reduction <add>, %142, %cst_47 [1] : vector<8x8xf32> to vector<8xf32>
    %144 = vector.shape_cast %143 : vector<8xf32> to vector<8x1xf32>
    %cst_48 = arith.constant dense<0.000000e+00> : vector<8x4xf32>
    %145 = tpu.matmul %142, %119, %cst_48 {dimension_numbers = #tpu.dot_dimension_numbers<[1], [0], [0], [1], [0, 0, 1, 1], [], []>} : vector<8x8xf32>, vector<8x4xf32>, vector<8x4xf32> -> vector<8x4xf32>
    %146 = tpu.reciprocal %144 {approx = true} : vector<8x1xf32> -> vector<8x1xf32>
    %147 = vector.broadcast %146 : vector<8x1xf32> to vector<8x4xf32>
    %148 = arith.mulf %145, %147 : vector<8x4xf32>
    %149 = vector.broadcast %122 : vector<1x4xf32> to vector<8x4xf32>
    %150 = arith.addf %148, %149 : vector<8x4xf32>
    %151 = tpu.concatenate %118, %150 in 1 : vector<8x4xf32>, vector<8x4xf32> -> vector<8x8xf32>
    %cst_49 = arith.constant dense<0xFF800000> : vector<8xf32>
    %152 = vector.multi_reduction <maximumf>, %151, %cst_49 [1] : vector<8x8xf32> to vector<8xf32>
    %153 = vector.shape_cast %152 : vector<8xf32> to vector<8x1xf32>
    %154 = vector.broadcast %153 : vector<8x1xf32> to vector<8x8xf32>
    %155 = arith.subf %151, %154 : vector<8x8xf32>
    %156 = math.exp %155 : vector<8x8xf32>
    %cst_50 = arith.constant dense<0.000000e+00> : vector<8xf32>
    %157 = vector.multi_reduction <add>, %156, %cst_50 [1] : vector<8x8xf32> to vector<8xf32>
    %158 = vector.shape_cast %157 : vector<8xf32> to vector<8x1xf32>
    %159 = math.log %158 : vector<8x1xf32>
    %160 = vector.broadcast %159 : vector<8x1xf32> to vector<8x8xf32>
    %161 = arith.subf %155, %160 : vector<8x8xf32>
    %c0_51 = arith.constant 0 : index
    %c0_52 = arith.constant 0 : index
    %162 = vector.load %arg6[%c0_51, %c0_52] : memref<8x8xf32, #tpu.memory_space<vmem>>, vector<8x8xf32>
    tpu.vector_store %arg6[%c0_51, %c0_52], %161 {strides = array<i32>} : memref<8x8xf32, #tpu.memory_space<vmem>>, vector<8x8xf32>,
    return
  }
}

</mosaic_0001>

<bundles_post_ra>
// kernel: tpu_custom_call.1
= control target key start
LH: loop header
LB: loop body
LE: loop exit
PB: predicated region body
PF: predicated region fallthrough
CT: control target
= control target key end

     0   :  { %11 = vsyncpa [#allocation3], 0  ;;  %s725_s0 = inlined_call_operand.vmem [shape: f32[8,16], index: 0, kind: input, shape index: {}]   ;;  %s726_s1 = inlined_call_operand.hbm [shape: f32[8,8], index: 1, kind: input, shape index: {}]   ;;  %s727_s2 = inlined_call_operand.vmem [shape: f32[16,16], index: 2, kind: input, shape index: {}]   ;;  %s728_s3 = inlined_call_operand.hbm [shape: f32[3,16], index: 3, kind: input, shape index: {}]   ;;  %s729_s4 = inlined_call_operand.vmem [shape: f32[16,8], index: 4, kind: input, shape index: {}]   ;;  %s730_s5 = inlined_call_operand.vmem [shape: f32[3,8], index: 5, kind: input, shape index: {}]   ;;  %s731_s6 = inlined_call_operand.hbm [shape: f32[8,8], index: 6, kind: output, shape index: {}]  }
   0x1   :  { %12 = vsyncpa [#allocation6], 0 }
   0x2   :  { %13 = vsyncpa [#allocation4], 0  ;;  %s21_s23 = sshll.u32 %s726_s1, 4  ;;  %s594_s24 = smov [#allocation2]   ;;  %s22_s23 = int_to_ptr.hbm [resolvable:$true] %s21_s23 }
   0x3   :  { %s23_s25 = sshll.u32 %s594_s24, 4  ;;  %s34_s28 = sshll.u32 %s728_s3, 4  ;;  %s24_s25 = int_to_ptr.vmem [resolvable:$true] %s23_s25  ;;  %s35_s28 = int_to_ptr.hbm [resolvable:$true] %s34_s28 }
   0x4   :  { %26 = dma.hbm_to_vmem [thread:$0]  %s22_s23, 128, %s24_s25, [#allocation3]  }
   0x5   :  { %s595_s29 = smov [#allocation5]  }
   0x6   :  { %s36_s30 = sshll.u32 %s595_s29, 4  ;;  %s37_s30 = int_to_ptr.vmem [resolvable:$true] %s36_s30 }
   0x7   :  { %39 = dma.hbm_to_vmem [thread:$0]  %s35_s28, 64, %s37_s30, [#allocation6]  }
   0x8   :  { %588 = dma.done.wait [#allocation3], 128  }
   0x9   :  { %589 = vsyncadd [#allocation3], 4294967168 }
   0xa   :  { %590 = dma.done.wait [#allocation6], 64  }
   0xb   :  { %591 = vsyncadd [#allocation6], 4294967232  ;;  %v56_v0 = vld [vmem:[%s727_s2 + $0x8] sm:$0xff]  ;;  %v55_v1 = vld [vmem:[%s727_s2] sm:$0xff]  ;;  %vm57_vm0 = vcmask 130048   ;;  %vm84_vm1 = vcmask 64512  }
   0xc   :  { %75 = vmatpush.msra.mxu0 %v56_v0  ;;  %v54_v2 = vld [vmem:[%s725_s0] sm:$0xff]  ;;  %v652_v3 = vld [vmem:[#allocation5] sm:$0x7]  ;;  %s596_s11 = smov 120   ;;  %s597_s0 = smov 8   ;;  %vm280_vm7 = vcmask 31744  }
   0xd   :  { %v82_v4 = vperm.slane %v652_v3, 1  ;;  %v666_v15 = vld [vmem:[#allocation2] sm:$0xff]  ;;  %v154_v38 = vperm.slane %v652_v3, 2  ;;  %v253_v51 = vld [vmem:[%s729_s4 + $0x8] sm:$0xff]  ;;  %s600_s17 = smov [#allocation7]   ;;  %s458_s21 = sshll.u32 %s731_s6, 4  ;;  %s459_s21 = int_to_ptr.hbm [resolvable:$true] %s458_s21 }
   0xe   :  { %76 = vmatpush.msra.mxu0 %v55_v1  ;;  %vm53_vm2 = vcmp.gt.f32.partialorder %v666_v15, 0.0  ;;  %v252_v53 = vld [vmem:[%s729_s4] sm:$0xff]  ;;  %s598_s4 = smov 124   ;;  %s456_s18 = sshll.u32 %s600_s17, 4  ;;  %s457_s18 = int_to_ptr.vmem [resolvable:$true] %s456_s18 }
   0xf   :  { %469 = vmatmul.msk.f32.vlgmr.msra.gmra.mxu0 %vm57_vm0, %v54_v2  ;;  %v692_v63 = vld [vmem:[%s730_s5] sm:$0x7]  ;;  %s599_s5 = smov 4  }
  0x10   :  { %271 = vmatpush.msrb.mxu0 %v253_v51  ;;  %v278_v1 = vperm.slane %v692_v63, 1 }
  0x12   :  { %272 = vmatpush.msrb.mxu0 %v252_v53 }
  0x8c   :  { %v78_v5 = vpop.f32.mrf.mxu0 }
  0x8d   :  { %170 = vrot.lane.b32.xlu0 %v78_v5, %s596_s11  ;;  %470 = vmatpush.xpose.msk.msra.mxu1 %vm84_vm1, %v78_v5  ;;  %v83_v6 = vmul.f32 %v82_v4, %v78_v5 }
  0x8e   :  { %147 = vmatpush.msra.mxu2 %v78_v5 }
  0x8f   :  { %162 = vrot.lane.b32.xlu1 %v83_v6, %s596_s11  ;;  %v85_v7 = vsel %vm84_vm1, %v83_v6, 0.0 }
  0x90   :  { %471 = vmatmul.msk.f32.vlgmr.msra.gmra.mxu1 %vm84_vm1, %v652_v3 }
  0x95   :  { %168 = vrot.lane.b32.xlu0 %v652_v3, %s596_s11 }
  0xb9   :  { %86 = vadd.xlane.f32.xlu1 %v85_v7 }
  0xff   :  { %v171_v8 = vpop.permute.xlu0 %170 }
 0x100   :  { %474 = vmatpush.xpose.msk.msra.mxu3 %vm84_vm1, %v171_v8  ;;  %230 = vmatpush.msrb.mxu2 %v171_v8 }
 0x101   :  { %v163_v9 = vpop.permute.xlu1 %162 }
 0x102   :  { %v165_v10 = vsel %vm84_vm1, %v163_v9, 0.0 }
 0x103   :  { %166 = vadd.xlane.f32.xlu2 %v165_v10 }
 0x107   :  { %v169_v11 = vpop.permute.xlu0 %168 }
 0x108   :  { %475 = vmatmul.msk.f32.vlgmr.msra.gmra.mxu3 %vm84_vm1, %v169_v11 }
 0x10d   :  { %v111_v12 = vpop.f32.mrf.mxu1 }
 0x10e   :  { %v114_v13 = vperm.slane %v111_v12, 0 }
 0x12c   :  { %v87_v14 = vpop.xlane.xlu1 %86 }
 0x12d   :  { %v115_v16 = vadd.f32 %v114_v13, %v87_v14 }
 0x12f   :  { %v117_v17 = vmul.f32 0.2, %v115_v16  ;;  %vm116_vm3 = vcmp.gt.f32.partialorder %v115_v16, 0.0 }
 0x131   :  { %v118_v18 = vsel %vm116_vm3, %v115_v16, %v117_v17 }
 0x132   :  { %v119_v19 = vsel %vm53_vm2, %v118_v18, -1e+30 }
 0x133   :  { %v120_v20 = vsel %vm84_vm1, %v119_v19, -inf }
 0x134   :  { %121 = vmax.xlane.f32.xlu2 %v120_v20 }
 0x176   :  { %v167_v23 = vpop.xlane.xlu2 %166 }
 0x18b   :  { %v193_v21 = vpop.f32.mrf.mxu3 }
 0x18c   :  { %v196_v22 = vperm.slane %v193_v21, 0 }
 0x18e   :  { %v197_v24 = vadd.f32 %v196_v22, %v167_v23 }
 0x190   :  { %vm198_vm4 = vcmp.gt.f32.partialorder %v197_v24, 0.0  ;;  %v199_v25 = vmul.f32 0.2, %v197_v24 }
 0x192   :  { %v200_v26 = vsel %vm198_vm4, %v197_v24, %v199_v25 }
 0x193   :  { %v201_v27 = vsel %vm53_vm2, %v200_v26, -1e+30 }
 0x194   :  { %v202_v28 = vsel %vm84_vm1, %v201_v27, -inf }
 0x195   :  { %203 = vmax.xlane.f32.xlu0 %v202_v28 }
 0x1a7   :  { %v122_v29 = vpop.xlane.xlu2 %121 }
 0x1a8   :  { %v123_v30 = vsub.f32 %v119_v19, %v122_v29 }
 0x1aa   :  { %v124_v31 = vmul.f32 1.442695, %v123_v30 }
 0x1ac   :  { %492 = vpow2.f32 %v124_v31 }
 0x1b2   :  { %v493_v32 = vpop.eup %492 }
 0x1b3   :  { %472 = vmatmul.msk.f32.vlgmr.msra.gmra.mxu2 %vm84_vm1, %v493_v32  ;;  %v126_v39 = vsel %vm84_vm1, %v493_v32, 0.0 }
 0x208   :  { %v204_v33 = vpop.xlane.xlu0 %203 }
 0x209   :  { %v205_v34 = vsub.f32 %v201_v27, %v204_v33 }
 0x20b   :  { %v206_v35 = vmul.f32 1.442695, %v205_v34  ;;  %v350_v34 = vperm.slane %v692_v63, 2 }
 0x20d   :  { %494 = vpow2.f32 %v206_v35 }
 0x213   :  { %v495_v36 = vpop.eup %494 }
 0x214   :  { %476 = vmatmul.msk.f32.vlgmr.msrb.gmra.mxu2 %vm84_vm1, %v495_v36  ;;  %v208_v37 = vsel %vm84_vm1, %v495_v36, 0.0 }
 0x215   :  { %209 = vadd.xlane.f32.xlu2 %v208_v37 }
 0x22d   :  { %238 = vrot.lane.b32.xlu2 %v154_v38, %s596_s11 }
 0x236   :  { %v149_v41 = vpop.f32.mrf.mxu2 }
 0x256   :  { %127 = vadd.xlane.f32.xlu2 %v126_v39 }
 0x288   :  { %v210_v40 = vpop.xlane.xlu2 %209 }
 0x289   :  { %496 = vrcp.f32 %v210_v40 }
 0x28f   :  { %v497_v42 = vpop.eup %496 }
 0x290   :  { %v239_v44 = vpop.permute.xlu2 %238 }
 0x297   :  { %v232_v43 = vpop.f32.mrf.mxu2 }
 0x298   :  { %v236_v45 = vmul.f32 %v497_v42, %v232_v43 }
 0x29a   :  { %v241_v46 = vadd.f32 %v239_v44, %v236_v45 }
 0x29c   :  { %v243_v47 = vmul.f32 1.442695, %v241_v46  ;;  %vm242_vm5 = vcmp.gt.f32.partialorder %v241_v46, 0.0 }
 0x29e   :  { %498 = vpow2.f32 %v243_v47 }
 0x2a4   :  { %v499_v48 = vpop.eup %498 }
 0x2a5   :  { %v477_v49 = vadd.f32 -1.0, %v499_v48 }
 0x2a7   :  { %v246_v50 = vsel %vm242_vm5, %v241_v46, %v477_v49 }
 0x2a8   :  { %248 = vrot.lane.b32.xlu1 %v246_v50, %s597_s0 }
 0x2b0   :  { %359 = vrot.lane.b32.xlu1 %v692_v63, %s598_s4 }
 0x2c9   :  { %v128_v52 = vpop.xlane.xlu2 %127 }
 0x2ca   :  { %500 = vrcp.f32 %v128_v52 }
 0x2d0   :  { %v501_v54 = vpop.eup %500 }
 0x2d1   :  { %v153_v55 = vmul.f32 %v501_v54, %v149_v41 }
 0x2d3   :  { %v155_v56 = vadd.f32 %v154_v38, %v153_v55 }
 0x2d5   :  { %v157_v57 = vmul.f32 1.442695, %v155_v56  ;;  %vm156_vm6 = vcmp.gt.f32.partialorder %v155_v56, 0.0 }
 0x2d7   :  { %502 = vpow2.f32 %v157_v57 }
 0x2dd   :  { %v503_v58 = vpop.eup %502 }
 0x2de   :  { %v473_v59 = vadd.f32 -1.0, %v503_v58 }
 0x2e0   :  { %v160_v61 = vsel %vm156_vm6, %v155_v56, %v473_v59 }
 0x31a   :  { %v249_v60 = vpop.permute.xlu1 %248 }
 0x31b   :  { %v251_v62 = vsel %vm84_vm1, %v160_v61, %v249_v60 }
 0x31c   :  { %478 = vmatmul.msk.f32.vlgmr.msrb.gmra.mxu0 %vm57_vm0, %v251_v62 }
 0x322   :  { %v360_v5 = vpop.permute.xlu1 %359 }
 0x399   :  { %v274_v0 = vpop.f32.mrf.mxu0 }
 0x39a   :  { %361 = vrot.lane.b32.xlu0 %v274_v0, %s598_s4  ;;  %479 = vmatpush.xpose.msk.msrb.mxu1 %vm280_vm7, %v274_v0  ;;  %v279_v2 = vmul.f32 %v278_v1, %v274_v0 }
 0x39b   :  { %343 = vmatpush.msrb.mxu3 %v274_v0 }
 0x39c   :  { %v281_v3 = vsel %vm280_vm7, %v279_v2, 0.0 }
 0x39d   :  { %480 = vmatmul.msk.f32.vlgmr.msrb.gmra.mxu1 %vm280_vm7, %v692_v63 }
 0x3a2   :  { %353 = vrot.lane.b32.xlu0 %v279_v2, %s598_s4 }
 0x3cc   :  { %282 = vadd.xlane.f32.xlu0 %v281_v3 }
 0x40c   :  { %v362_v4 = vpop.permute.xlu0 %361 }
 0x40d   :  { %482 = vmatpush.xpose.msk.msra.mxu2 %vm280_vm7, %v362_v4  ;;  %421 = vmatpush.msra.mxu0 %v362_v4 }
 0x410   :  { %483 = vmatmul.msk.f32.vlgmr.msra.gmra.mxu2 %vm280_vm7, %v360_v5 }
 0x414   :  { %v354_v6 = vpop.permute.xlu0 %353 }
 0x415   :  { %v356_v7 = vsel %vm280_vm7, %v354_v6, 0.0 }
 0x416   :  { %357 = vadd.xlane.f32.xlu1 %v356_v7 }
 0x41a   :  { %v307_v8 = vpop.f32.mrf.mxu1 }
 0x41b   :  { %v310_v9 = vperm.slane %v307_v8, 0 }
 0x43f   :  { %v283_v10 = vpop.xlane.xlu0 %282 }
 0x440   :  { %v311_v14 = vadd.f32 %v310_v9, %v283_v10 }
 0x442   :  { %v313_v18 = vmul.f32 0.2, %v311_v14  ;;  %vm312_vm9 = vcmp.gt.f32.partialorder %v311_v14, 0.0 }
 0x444   :  { %v314_v22 = vsel %vm312_vm9, %v311_v14, %v313_v18 }
 0x445   :  { %v315_v23 = vsel %vm53_vm2, %v314_v22, -1e+30 }
 0x446   :  { %v316_v24 = vsel %vm84_vm1, %v315_v23, -inf }
 0x489   :  { %v358_v13 = vpop.xlane.xlu1 %357 }
 0x493   :  { %v384_v11 = vpop.f32.mrf.mxu2 }
 0x494   :  { %v387_v12 = vperm.slane %v384_v11, 0 }
 0x496   :  { %v388_v16 = vadd.f32 %v387_v12, %v358_v13 }
 0x498   :  { %v390_v17 = vmul.f32 0.2, %v388_v16  ;;  %vm389_vm8 = vcmp.gt.f32.partialorder %v388_v16, 0.0 }
 0x49a   :  { %v391_v19 = vsel %vm389_vm8, %v388_v16, %v390_v17 }
 0x49b   :  { %v392_v20 = vsel %vm53_vm2, %v391_v19, -1e+30 }
 0x49c   :  { %v393_v21 = vsel %vm84_vm1, %v392_v20, -inf }
 0x49d   :  { %394 = vmax.xlane.f32.xlu2 %v393_v21 }
 0x4a5   :  { %317 = vmax.xlane.f32.xlu2 %v316_v24 }
 0x510   :  { %v395_v25 = vpop.xlane.xlu2 %394 }
 0x511   :  { %v396_v26 = vsub.f32 %v392_v20, %v395_v25 }
 0x513   :  { %v397_v27 = vmul.f32 1.442695, %v396_v26 }
 0x515   :  { %504 = vpow2.f32 %v397_v27 }
 0x518   :  { %v318_v28 = vpop.xlane.xlu2 %317 }
 0x519   :  { %v319_v29 = vsub.f32 %v315_v23, %v318_v28 }
 0x51b   :  { %v505_v30 = vpop.eup %504  ;;  %v320_v31 = vmul.f32 1.442695, %v319_v29 }
 0x51c   :  { %484 = vmatmul.msk.f32.vlgmr.msra.gmra.mxu0 %vm84_vm1, %v505_v30  ;;  %v399_v32 = vsel %vm84_vm1, %v505_v30, 0.0 }
 0x51d   :  { %506 = vpow2.f32 %v320_v31  ;;  %400 = vadd.xlane.f32.xlu2 %v399_v32 }
 0x523   :  { %v507_v33 = vpop.eup %506 }
 0x524   :  { %481 = vmatmul.msk.f32.vlgmr.msrb.gmra.mxu3 %vm84_vm1, %v507_v33  ;;  %v322_v15 = vsel %vm84_vm1, %v507_v33, 0.0 }
 0x525   :  { %323 = vadd.xlane.f32.xlu1 %v322_v15 }
 0x535   :  { %429 = vrot.lane.b32.xlu2 %v350_v34, %s598_s4 }
 0x590   :  { %v401_v35 = vpop.xlane.xlu2 %400 }
 0x591   :  { %508 = vrcp.f32 %v401_v35 }
 0x597   :  { %v509_v36 = vpop.eup %508 }
 0x598   :  { %v430_v38 = vpop.permute.xlu2 %429  ;;  %v324_v41 = vpop.xlane.xlu1 %323 }
 0x599   :  { %v423_v37 = vpop.f32.mrf.mxu0  ;;  %510 = vrcp.f32 %v324_v41 }
 0x59a   :  { %v427_v39 = vmul.f32 %v509_v36, %v423_v37 }
 0x59c   :  { %v432_v40 = vadd.f32 %v430_v38, %v427_v39 }
 0x59e   :  { %434 = vrot.lane.b32.xlu0 %v432_v40, %s599_s5 }
 0x59f   :  { %v511_v43 = vpop.eup %510 }
 0x5a7   :  { %v345_v42 = vpop.f32.mrf.mxu3 }
 0x5a8   :  { %v349_v44 = vmul.f32 %v511_v43, %v345_v42 }
 0x5aa   :  { %v351_v45 = vadd.f32 %v350_v34, %v349_v44 }
 0x610   :  { %v435_v46 = vpop.permute.xlu0 %434 }
 0x611   :  { %v437_v47 = vsel %vm280_vm7, %v351_v45, %v435_v46 }
 0x612   :  { %v438_v48 = vsel %vm84_vm1, %v437_v47, -inf }
 0x613   :  { %439 = vmax.xlane.f32.xlu1 %v438_v48 }
 0x686   :  { %v440_v49 = vpop.xlane.xlu1 %439 }
 0x687   :  { %v441_v50 = vsub.f32 %v437_v47, %v440_v49 }
 0x689   :  { %v442_v51 = vmul.f32 1.442695, %v441_v50 }
 0x68b   :  { %512 = vpow2.f32 %v442_v51 }
 0x691   :  { %v513_v52 = vpop.eup %512 }
 0x692   :  { %v444_v53 = vsel %vm84_vm1, %v513_v52, 0.0 }
 0x693   :  { %445 = vadd.xlane.f32.xlu2 %v444_v53 }
 0x706   :  { %v446_v54 = vpop.xlane.xlu2 %445 }
 0x707   :  { %514 = vlog2.f32 %v446_v54 }
 0x70d   :  { %v515_v55 = vpop.eup %514 }
 0x70e   :  { %v448_v56 = vmul.f32 0.6931472, %v515_v55 }
 0x710   :  { %v449_v57 = vsub.f32 %v441_v50, %v448_v56 }
 0x712   :  { %450 = vst.msk [vmem:[#allocation7] sm:$0xff] %vm84_vm1, %v449_v57 }
 0x713   :  { %461 = dma.vmem_to_hbm [thread:$0]  %s457_s18, 128, %s459_s21, [#allocation4]  }
 0x714   :  { %592 = dma.done.wait [#allocation4], 128  }
 0x715   :  { %593 = vsyncadd [#allocation4], 4294967168 }
 0x716   :  { %466 = vsyncpa [#allocation3], 1 }
 0x717   :  { %467 = vsyncpa [#allocation6], 1 }
 0x718   :  { %468 = vsyncpa [#allocation4], 1 }

</bundles_post_ra>
